<compile_context>
chip_gen: v6e
topology: v6e:2x2x1
jax: 0.10.0
libtpu: 0.0.40
codegen_flags: <defaults>
</compile_context>

<pallas_src>
import jax
import jax.numpy as jnp
import numpy as np
from jax.experimental import pallas as pl
from jax.experimental.pallas import tpu as pltpu


def _round_up(n, m):
    return ((n + m - 1) // m) * m


def _stats_kernel(x_ref, basis_ref, out_ref):
    # x_ref    : (R_TILE, T)      rows = batch*channel, lanes = time samples
    # basis_ref: (T, 2*Fp)        [cos | sin] real-DFT basis, Fp = roundup(F,128)
    # out_ref  : (R_TILE, 9)      per-row statistics
    x2 = x_ref[...]
    _, T = x2.shape
    Fp = basis_ref.shape[1] // 2
    F = T // 2 + 1

    # ---- time-domain statistics (single-pass lane reductions) ----
    mean = jnp.mean(x2, axis=-1, keepdims=True)                      # (R, 1)
    centered = x2 - mean
    sq_sum = jnp.sum(centered * centered, axis=-1, keepdims=True)    # (R, 1)
    std = jnp.sqrt(sq_sum / (T - 1))                                 # torch.std (ddof=1)
    mx = jnp.max(x2, axis=-1, keepdims=True)
    mn = jnp.min(x2, axis=-1, keepdims=True)

    # ---- adjacent-sample terms: zero crossings + circular lag-1 autocorr ----
    if T % 128 == 0:
        # Lane-aligned T: native XLU lane rotate (per perf feedback).
        x_prev = pltpu.roll(x2, shift=1, axis=1)                     # x[(t-1) % T]
        c_prev = pltpu.roll(centered, shift=1, axis=1)
        lane = jax.lax.broadcasted_iota(jnp.int32, x2.shape, 1)
        neg = jnp.logical_and(lane >= 1, (x2 * x_prev) < 0.0)        # drop wrap pair
        zero_cross = jnp.sum(neg.astype(jnp.float32), axis=-1, keepdims=True)
        ac_num = jnp.sum(centered * c_prev, axis=-1, keepdims=True)  # circular sum
    else:
        # Sub-vreg T: offset-1 lane slices (one lane-shift relayout, no MXU).
        adj = x2[:, :-1] * x2[:, 1:]
        zero_cross = jnp.sum((adj < 0.0).astype(jnp.float32),
                             axis=-1, keepdims=True)
        c_adj = centered[:, :-1] * centered[:, 1:]
        wrap = centered[:, :1] * centered[:, T - 1:]                 # c[0]*c[T-1]
        ac_num = jnp.sum(c_adj, axis=-1, keepdims=True) + wrap
    autocorr = ac_num / sq_sum                                       # matches torch (no eps)

    # ---- spectral statistics: one fused, lane-aligned cos|sin DFT matmul ----
    spec = jnp.dot(x2, basis_ref[...], preferred_element_type=jnp.float32)  # (R, 2Fp)
    re = spec[:, :Fp]                                                # aligned split
    im = spec[:, Fp:]
    mag = jnp.sqrt(re * re + im * im)                                # padded bins == 0
    fft_mean = jnp.sum(mag, axis=-1, keepdims=True) / F
    lane_f = jax.lax.broadcasted_iota(jnp.int32, mag.shape, 1)
    dev = jnp.where(lane_f < F, mag - fft_mean, 0.0)                 # mask padded bins
    fft_std = jnp.sqrt(jnp.sum(dev * dev, axis=-1, keepdims=True) / (F - 1))
    fft_max = jnp.max(mag, axis=-1, keepdims=True)                   # mag >= 0, pads are 0

    # ---- per-row output slab (no in-kernel relayouts) ----
    out_ref[:, 0:1] = mean
    out_ref[:, 1:2] = std
    out_ref[:, 2:3] = mx
    out_ref[:, 3:4] = mn
    out_ref[:, 4:5] = zero_cross
    out_ref[:, 5:6] = fft_mean
    out_ref[:, 6:7] = fft_std
    out_ref[:, 7:8] = fft_max
    out_ref[:, 8:9] = autocorr


def make_dft_basis(T):
    """(T, 2*Fp) fused real-DFT basis: [cos | sin], Fp lane-aligned to 128."""
    F = T // 2 + 1
    Fp = _round_up(F, 128)
    t = np.arange(T, dtype=np.float64)[:, None]
    f = np.arange(F, dtype=np.float64)[None, :]
    ang = 2.0 * np.pi * t * f / T
    basis = np.zeros((T, 2 * Fp), dtype=np.float32)
    basis[:, :F] = np.cos(ang)
    basis[:, Fp:Fp + F] = np.sin(ang)                # sign irrelevant for |rfft|
    return jnp.asarray(basis)


@jax.jit
def interpretable_feature_extractor(x, basis, w, b):
    B, C, T = x.shape
    R = B * C
    Fp = basis.shape[1] // 2

    # Flatten (B, C, T) -> (B*C, T) wrapper-side (layout plumbing, not compute).
    x2 = x.reshape(R, T)

    # Row tile sized from a VMEM working-set budget: input row + T-wide temps
    # + (2*Fp)-wide spectrum/magnitude temporaries, ~8 MiB total working set.
    per_row_bytes = 4 * (4 * T + 6 * Fp)
    rows = max(8, (8 << 20) // per_row_bytes)
    rows -= rows % 8
    r_tile = R if R <= rows else rows

    basis_bytes = int(basis.size) * basis.dtype.itemsize
    need = (2 * (r_tile * T * 4 + r_tile * 9 * 4)        # double-buffered in/out blocks
            + basis_bytes                                # single-buffered constant
            + r_tile * 6 * Fp * 4                        # spectral temporaries
            + (4 << 20))                                 # headroom
    vmem_limit = int(min(max(need, 16 << 20), 64 << 20))

    flops = 2 * R * T * (2 * Fp) + 12 * R * T
    transcendentals = R * (Fp + 2)
    bytes_accessed = R * T * 4 + basis_bytes + R * 9 * 4

    stats = pl.pallas_call(
        _stats_kernel,
        out_shape=jax.ShapeDtypeStruct((R, 9), jnp.float32),
        grid=(pl.cdiv(R, r_tile),),
        in_specs=[
            pl.BlockSpec((r_tile, T), lambda i: (i, 0)),               # pipelined rows
            pl.BlockSpec(basis.shape, lambda i: (0, 0),                # resident constant,
                         pipeline_mode=pl.Buffered(1)),                # single-buffered
        ],
        out_specs=pl.BlockSpec((r_tile, 9), lambda i: (i, 0)),
        compiler_params=pltpu.CompilerParams(
            dimension_semantics=("parallel",),
            vmem_limit_bytes=vmem_limit),
        cost_estimate=pl.CostEstimate(flops=int(flops),
                                      transcendentals=int(transcendentals),
                                      bytes_accessed=int(bytes_accessed)),
    )(x2, basis)

    # PyTorch concat order: cat([mean, std, max, min, zc, fft_mean, fft_std,
    # fft_max, autocorr], dim=1) -> feature index s*C + c (stat-major).
    feats = jnp.transpose(stats.reshape(B, C, 9), (0, 2, 1)).reshape(B, 9 * C)
    # Dense projection (nn.Linear) as a plain XLA matmul in the same jit.
    return jnp.dot(feats, w) + b


if __name__ == "__main__":
    # Small shapes consistent with the forward: (batch, channels, time)
    B, C, T = 2, 4, 16
    feature_dim = 32
    n_stats = 9
    in_features = n_stats * C       # see TODO(synk) at top of file

    key = jax.random.PRNGKey(0)
    kx, kw, kb = jax.random.split(key, 3)
    x = jax.random.normal(kx, (B, C, T), dtype=jnp.float32)

    bound = 1.0 / float(np.sqrt(in_features))
    w = jax.random.uniform(kw, (in_features, feature_dim), jnp.float32, -bound, bound)
    b = jax.random.uniform(kb, (feature_dim,), jnp.float32, -bound, bound)

    basis = make_dft_basis(T)

    out = interpretable_feature_extractor(x, basis, w, b)
    out = jax.block_until_ready(out)

    # ---- pure-numpy float64 reference of the PyTorch forward ----
    xn = np.asarray(x, dtype=np.float64)
    mean = xn.mean(2)
    std = xn.std(2, ddof=1)
    mx = xn.max(2)
    mn = xn.min(2)
    zc = (xn[:, :, :-1] * xn[:, :, 1:] < 0).sum(2).astype(np.float64)
    mag = np.abs(np.fft.rfft(xn, axis=2))
    fm = mag.mean(2)
    fs = mag.std(2, ddof=1)
    fx = mag.max(2)
    xc = xn - mean[:, :, None]
    ac = (xc * np.roll(xc, 1, axis=2)).sum(2) / (xc ** 2).sum(2)
    feats_ref = np.concatenate([mean, std, mx, mn, zc, fm, fs, fx, ac], axis=1)
    ref = feats_ref @ np.asarray(w, np.float64) + np.asarray(b, np.float64)

    np.testing.assert_allclose(np.asarray(out), ref, rtol=1e-3, atol=1e-3)
    print("KERNEL_OK")
</pallas_src>

<mosaic_0001>
module attributes {stable_mosaic.version = 11 : i64} {
  func.func @_stats_kernel(%arg0: i32, %arg1: memref<8x16xf32, #tpu.memory_space<vmem>>, %arg2: memref<16x256xf32, #tpu.memory_space<vmem>>, %arg3: memref<8x9xf32, #tpu.memory_space<vmem>>) attributes {dimension_semantics = [#tpu.dimension_semantics<parallel>], iteration_bounds = array<i64: 1>, scalar_prefetch = 0 : i64, scratch_operands = 0 : i64, tpu.core_type = #tpu.core_type<tc>, window_params = [{transform_indices = @transform_0, window_bounds = array<i64: 8, 16>}, {pipeline_mode = #tpu.pipeline_mode<synchronous>, transform_indices = @transform_1, window_bounds = array<i64: 16, 256>}, {transform_indices = @transform_2, window_bounds = array<i64: 8, 9>}]} {
    %c0 = arith.constant 0 : index
    %c0_0 = arith.constant 0 : index
    %0 = vector.load %arg1[%c0, %c0_0] : memref<8x16xf32, #tpu.memory_space<vmem>>, vector<8x16xf32>
    %cst = arith.constant dense<0.000000e+00> : vector<8xf32>
    %1 = vector.multi_reduction <add>, %0, %cst [1] : vector<8x16xf32> to vector<8xf32>
    %2 = vector.shape_cast %1 : vector<8xf32> to vector<8x1xf32>
    %cst_1 = arith.constant 1.600000e+01 : f32
    %3 = vector.broadcast %cst_1 : f32 to vector<8x1xf32>
    %4 = arith.divf %2, %3 : vector<8x1xf32>
    %5 = vector.broadcast %4 : vector<8x1xf32> to vector<8x16xf32>
    %6 = arith.subf %0, %5 : vector<8x16xf32>
    %7 = arith.mulf %6, %6 : vector<8x16xf32>
    %cst_2 = arith.constant dense<0.000000e+00> : vector<8xf32>
    %8 = vector.multi_reduction <add>, %7, %cst_2 [1] : vector<8x16xf32> to vector<8xf32>
    %9 = vector.shape_cast %8 : vector<8xf32> to vector<8x1xf32>
    %cst_3 = arith.constant 1.500000e+01 : f32
    %10 = vector.broadcast %cst_3 : f32 to vector<8x1xf32>
    %11 = arith.divf %9, %10 : vector<8x1xf32>
    %12 = math.sqrt %11 : vector<8x1xf32>
    %cst_4 = arith.constant dense<0xFF800000> : vector<8xf32>
    %13 = vector.multi_reduction <maximumf>, %0, %cst_4 [1] : vector<8x16xf32> to vector<8xf32>
    %14 = vector.shape_cast %13 : vector<8xf32> to vector<8x1xf32>
    %cst_5 = arith.constant dense<0x7F800000> : vector<8xf32>
    %15 = vector.multi_reduction <minimumf>, %0, %cst_5 [1] : vector<8x16xf32> to vector<8xf32>
    %16 = vector.shape_cast %15 : vector<8xf32> to vector<8x1xf32>
    %17 = vector.extract_strided_slice %0 {offsets = [0, 0], sizes = [8, 15], strides = [1, 1]} : vector<8x16xf32> to vector<8x15xf32>
    %18 = vector.extract_strided_slice %0 {offsets = [0, 1], sizes = [8, 15], strides = [1, 1]} : vector<8x16xf32> to vector<8x15xf32>
    %19 = arith.mulf %17, %18 : vector<8x15xf32>
    %cst_6 = arith.constant 0.000000e+00 : f32
    %20 = vector.broadcast %cst_6 : f32 to vector<8x15xf32>
    %21 = arith.cmpf olt, %19, %20 : vector<8x15xf32>
    %22 = arith.extui %21 : vector<8x15xi1> to vector<8x15xi32>
    %23 = arith.sitofp %22 : vector<8x15xi32> to vector<8x15xf32>
    %cst_7 = arith.constant dense<0.000000e+00> : vector<8xf32>
    %24 = vector.multi_reduction <add>, %23, %cst_7 [1] : vector<8x15xf32> to vector<8xf32>
    %25 = vector.shape_cast %24 : vector<8xf32> to vector<8x1xf32>
    %26 = vector.extract_strided_slice %6 {offsets = [0, 0], sizes = [8, 15], strides = [1, 1]} : vector<8x16xf32> to vector<8x15xf32>
    %27 = vector.extract_strided_slice %6 {offsets = [0, 1], sizes = [8, 15], strides = [1, 1]} : vector<8x16xf32> to vector<8x15xf32>
    %28 = arith.mulf %26, %27 : vector<8x15xf32>
    %29 = vector.extract_strided_slice %6 {offsets = [0, 0], sizes = [8, 1], strides = [1, 1]} : vector<8x16xf32> to vector<8x1xf32>
    %30 = vector.extract_strided_slice %6 {offsets = [0, 15], sizes = [8, 1], strides = [1, 1]} : vector<8x16xf32> to vector<8x1xf32>
    %31 = arith.mulf %29, %30 : vector<8x1xf32>
    %cst_8 = arith.constant dense<0.000000e+00> : vector<8xf32>
    %32 = vector.multi_reduction <add>, %28, %cst_8 [1] : vector<8x15xf32> to vector<8xf32>
    %33 = vector.shape_cast %32 : vector<8xf32> to vector<8x1xf32>
    %34 = arith.addf %33, %31 : vector<8x1xf32>
    %35 = arith.divf %34, %9 : vector<8x1xf32>
    %c0_9 = arith.constant 0 : index
    %c0_10 = arith.constant 0 : index
    %36 = vector.load %arg2[%c0_9, %c0_10] : memref<16x256xf32, #tpu.memory_space<vmem>>, vector<16x256xf32>
    %cst_11 = arith.constant dense<0.000000e+00> : vector<8x256xf32>
    %37 = tpu.matmul %0, %36, %cst_11 {dimension_numbers = #tpu.dot_dimension_numbers<[1], [0], [0], [1], [0, 0, 1, 1], [], []>} : vector<8x16xf32>, vector<16x256xf32>, vector<8x256xf32> -> vector<8x256xf32>
    %38 = vector.extract_strided_slice %37 {offsets = [0, 0], sizes = [8, 128], strides = [1, 1]} : vector<8x256xf32> to vector<8x128xf32>
    %39 = vector.extract_strided_slice %37 {offsets = [0, 128], sizes = [8, 128], strides = [1, 1]} : vector<8x256xf32> to vector<8x128xf32>
    %40 = arith.mulf %38, %38 : vector<8x128xf32>
    %41 = arith.mulf %39, %39 : vector<8x128xf32>
    %42 = arith.addf %40, %41 : vector<8x128xf32>
    %43 = math.sqrt %42 : vector<8x128xf32>
    %cst_12 = arith.constant dense<0.000000e+00> : vector<8xf32>
    %44 = vector.multi_reduction <add>, %43, %cst_12 [1] : vector<8x128xf32> to vector<8xf32>
    %45 = vector.shape_cast %44 : vector<8xf32> to vector<8x1xf32>
    %cst_13 = arith.constant 9.000000e+00 : f32
    %46 = vector.broadcast %cst_13 : f32 to vector<8x1xf32>
    %47 = arith.divf %45, %46 : vector<8x1xf32>
    %48 = tpu.iota {dimensions = array<i32: 1>} : vector<8x128xi32>
    %c9_i32 = arith.constant 9 : i32
    %49 = vector.broadcast %c9_i32 : i32 to vector<8x128xi32>
    %50 = arith.cmpi slt, %48, %49 : vector<8x128xi32>
    %51 = vector.broadcast %47 : vector<8x1xf32> to vector<8x128xf32>
    %52 = arith.subf %43, %51 : vector<8x128xf32>
    %cst_14 = arith.constant 0.000000e+00 : f32
    %53 = vector.broadcast %cst_14 : f32 to vector<8x128xf32>
    %54 = arith.select %50, %52, %53 : vector<8x128xi1>, vector<8x128xf32>
    %55 = arith.mulf %54, %54 : vector<8x128xf32>
    %cst_15 = arith.constant dense<0.000000e+00> : vector<8xf32>
    %56 = vector.multi_reduction <add>, %55, %cst_15 [1] : vector<8x128xf32> to vector<8xf32>
    %57 = vector.shape_cast %56 : vector<8xf32> to vector<8x1xf32>
    %cst_16 = arith.constant 8.000000e+00 : f32
    %58 = vector.broadcast %cst_16 : f32 to vector<8x1xf32>
    %59 = arith.divf %57, %58 : vector<8x1xf32>
    %60 = math.sqrt %59 : vector<8x1xf32>
    %cst_17 = arith.constant dense<0xFF800000> : vector<8xf32>
    %61 = vector.multi_reduction <maximumf>, %43, %cst_17 [1] : vector<8x128xf32> to vector<8xf32>
    %62 = vector.shape_cast %61 : vector<8xf32> to vector<8x1xf32>
    %c0_18 = arith.constant 0 : index
    %c0_19 = arith.constant 0 : index
    %63 = vector.load %arg3[%c0_18, %c0_19] : memref<8x9xf32, #tpu.memory_space<vmem>>, vector<8x1xf32>
    tpu.vector_store %arg3[%c0_18, %c0_19], %4 {strides = array<i32>} : memref<8x9xf32, #tpu.memory_space<vmem>>, vector<8x1xf32>,
    %c0_20 = arith.constant 0 : index
    %c1 = arith.constant 1 : index
    %64 = vector.load %arg3[%c0_20, %c1] : memref<8x9xf32, #tpu.memory_space<vmem>>, vector<8x1xf32>
    tpu.vector_store %arg3[%c0_20, %c1], %12 {strides = array<i32>} : memref<8x9xf32, #tpu.memory_space<vmem>>, vector<8x1xf32>,
    %c0_21 = arith.constant 0 : index
    %c2 = arith.constant 2 : index
    %65 = vector.load %arg3[%c0_21, %c2] : memref<8x9xf32, #tpu.memory_space<vmem>>, vector<8x1xf32>
    tpu.vector_store %arg3[%c0_21, %c2], %14 {strides = array<i32>} : memref<8x9xf32, #tpu.memory_space<vmem>>, vector<8x1xf32>,
    %c0_22 = arith.constant 0 : index
    %c3 = arith.constant 3 : index
    %66 = vector.load %arg3[%c0_22, %c3] : memref<8x9xf32, #tpu.memory_space<vmem>>, vector<8x1xf32>
    tpu.vector_store %arg3[%c0_22, %c3], %16 {strides = array<i32>} : memref<8x9xf32, #tpu.memory_space<vmem>>, vector<8x1xf32>,
    %c0_23 = arith.constant 0 : index
    %c4 = arith.constant 4 : index
    %67 = vector.load %arg3[%c0_23, %c4] : memref<8x9xf32, #tpu.memory_space<vmem>>, vector<8x1xf32>
    tpu.vector_store %arg3[%c0_23, %c4], %25 {strides = array<i32>} : memref<8x9xf32, #tpu.memory_space<vmem>>, vector<8x1xf32>,
    %c0_24 = arith.constant 0 : index
    %c5 = arith.constant 5 : index
    %68 = vector.load %arg3[%c0_24, %c5] : memref<8x9xf32, #tpu.memory_space<vmem>>, vector<8x1xf32>
    tpu.vector_store %arg3[%c0_24, %c5], %47 {strides = array<i32>} : memref<8x9xf32, #tpu.memory_space<vmem>>, vector<8x1xf32>,
    %c0_25 = arith.constant 0 : index
    %c6 = arith.constant 6 : index
    %69 = vector.load %arg3[%c0_25, %c6] : memref<8x9xf32, #tpu.memory_space<vmem>>, vector<8x1xf32>
    tpu.vector_store %arg3[%c0_25, %c6], %60 {strides = array<i32>} : memref<8x9xf32, #tpu.memory_space<vmem>>, vector<8x1xf32>,
    %c0_26 = arith.constant 0 : index
    %c7 = arith.constant 7 : index
    %70 = vector.load %arg3[%c0_26, %c7] : memref<8x9xf32, #tpu.memory_space<vmem>>, vector<8x1xf32>
    tpu.vector_store %arg3[%c0_26, %c7], %62 {strides = array<i32>} : memref<8x9xf32, #tpu.memory_space<vmem>>, vector<8x1xf32>,
    %c0_27 = arith.constant 0 : index
    %c8 = arith.constant 8 : index
    %71 = vector.load %arg3[%c0_27, %c8] : memref<8x9xf32, #tpu.memory_space<vmem>>, vector<8x1xf32>
    tpu.vector_store %arg3[%c0_27, %c8], %35 {strides = array<i32>} : memref<8x9xf32, #tpu.memory_space<vmem>>, vector<8x1xf32>,
    return
  }
  func.func @transform_0(%arg0: i32) -> (i32, i32) {
    %c0_i32 = arith.constant 0 : i32
    %c0_i32_0 = arith.constant 0 : i32
    return %arg0, %c0_i32 : i32, i32
  }
  func.func @transform_1(%arg0: i32) -> (i32, i32) {
    %c0_i32 = arith.constant 0 : i32
    %c0_i32_0 = arith.constant 0 : i32
    %c0_i32_1 = arith.constant 0 : i32
    return %c0_i32, %c0_i32_0 : i32, i32
  }
  func.func @transform_2(%arg0: i32) -> (i32, i32) {
    %c0_i32 = arith.constant 0 : i32
    %c0_i32_0 = arith.constant 0 : i32
    return %arg0, %c0_i32 : i32, i32
  }
}

</mosaic_0001>

<bundles_post_ra>
// kernel: interpretable_feature_extractor.1
= control target key start
LH: loop header
LB: loop body
LE: loop exit
PB: predicated region body
PF: predicated region fallthrough
CT: control target
= control target key end

     0   :  { %7 = vsyncpa [#allocation3], 0  ;;  %s373_s0 = inlined_call_operand.hbm [shape: f32[8,16], index: 0, kind: input, shape index: {}]   ;;  %s374_s1 = inlined_call_operand.hbm [shape: f32[16,256], index: 1, kind: input, shape index: {}]   ;;  %s375_s2 = inlined_call_operand.vmem [shape: f32[8,9], index: 2, kind: output, shape index: {}]  }
   0x1   :  { %8 = vsyncpa [#allocation5], 0  ;;  %s291_s9 = smov [#allocation2]   ;;  %s292_s11 = smov [#allocation4]  }
   0x2   :  { %s15_s10 = sshll.u32 %s291_s9, 4  ;;  %s24_s12 = sshll.u32 %s292_s11, 4  ;;  %s16_s10 = int_to_ptr.vmem [resolvable:$true] %s15_s10  ;;  %s25_s12 = int_to_ptr.vmem [resolvable:$true] %s24_s12 }
   0x3   :  { %s255_s13 = scalar_lea.vmem %s16_s10, 128  ;;  %p260_p1 = scmp.lt.s32.totalorder %s16_s10, %s16_s10 }
   0x4   :  { %p256_p0 = scmp.ne.s32.totalorder %s16_s10, %s255_s13  ;;  %p261_p2 = scmp.lt.s32.totalorder %s255_s13, %s255_s13 }
   0x6   :  { %p262_p3 = por %p261_p2, %p260_p1 }
   0x8   :  { %p263_p4 = pnand %p262_p3, %p256_p0 }
   0xa   :  { %266 = shalt.err (!%p263_p4)
}
   0xb   :  { %18 = dma.hbm_to_vmem [thread:$0]  %s373_s0, 128, %s16_s10, [#allocation3]  }
   0xc   :  { %s275_s16 = scalar_lea.vmem %s25_s12, 512  ;;  %p280_p6 = scmp.lt.s32.totalorder %s25_s12, %s25_s12 }
   0xd   :  { %p276_p5 = scmp.ne.s32.totalorder %s25_s12, %s275_s16  ;;  %p281_p7 = scmp.lt.s32.totalorder %s275_s16, %s275_s16 }
   0xf   :  { %p282_p8 = por %p281_p7, %p280_p6 }
  0x11   :  { %p283_p9 = pnand %p282_p8, %p276_p5 }
  0x13   :  { %286 = shalt.err (!%p283_p9)
}
  0x14   :  { %s293_s17 = smov 256   ;;  %s294_s18 = smov 16  }
  0x15   :  { %30 = dma.hbm_to_vmem [thread:$0]  %s374_s1, 512, %s25_s12, [#allocation5], %s293_s17, %s293_s17, %s294_s18  }
  0x16   :  { %287 = dma.done.wait [#allocation3], 128  }
  0x17   :  { %288 = vsyncadd [#allocation3], 4294967168 }
  0x18   :  { %289 = dma.done.wait [#allocation5], 512  }
  0x19   :  { %290 = vsyncadd [#allocation5], 4294966784  ;;  %v295_v0 = vmov 0.0   ;;  %vm38_vm0 = vcmask 130048   ;;  %v94_v1 = vld [vmem:[#allocation4 + $0x18] sm:$0xff]  ;;  %v93_v2 = vld [vmem:[#allocation4 + $0x10] sm:$0xff]  ;;  %v182_v34 = vlaneseq }
  0x1a   :  { %161 = vmatprep.mubr.f32.mxu0 %v295_v0  ;;  %v321_v3 = vld [vmem:[#allocation2] sm:$0xff]  ;;  %125 = vmatprep.subr.mxu0 %v94_v1  ;;  %v92_v5 = vld [vmem:[#allocation4 + $0x8] sm:$0xff]  ;;  %v91_v6 = vld [vmem:[#allocation4] sm:$0xff]  ;;  %vm201_vm1 = vcmask 7168   ;;  %s296_s21 = smov 127   ;;  %s297_s22 = smov 113  }
  0x1b   :  { %v39_v4 = vsel %vm38_vm0, %v321_v3, 0.0  ;;  %126 = vmatpush1.msra.mxu0 %v93_v2  ;;  %v58_v22 = vsel %vm38_vm0, %v321_v3, -inf  ;;  %vm72_vm4 = vcmask 121856   ;;  %v61_v26 = vsel %vm38_vm0, %v321_v3, inf  ;;  %s298_s27 = smov 8  }
  0x1c   :  { %40 = vadd.xlane.f32.xlu0 %v39_v4  ;;  %127 = vmatprep.subr.mxu0 %v92_v5  ;;  %vm203_vm5 = vcmask 15368   ;;  %v183_v35 = vand.u32 127, %v182_v34  ;;  %vm205_vm10 = vcmask 23568   ;;  %vm207_vm11 = vcmask 31768  }
  0x1d   :  { %128 = vmatpush1.msra.mxu0 %v91_v6  ;;  %vm209_vm12 = vcmask 39968   ;;  %vm211_vm13 = vcmask 48168   ;;  %vm213_vm15 = vcmask 56368  }
  0x1e   :  { %230 = vmatmul.mubr.msk.f32.vlgmr.msra.gmra.mxu0 %vm38_vm0, %v321_v3  ;;  %vm184_vm8 = vcmp.lt.s32.totalorder %v183_v35, 9 }
  0xa5   :  { %v41_v7 = vpop.xlane.xlu0 %40 }
  0xa6   :  { %v43_v8 = vmul.f32 0.0625, %v41_v7 }
  0xa8   :  { %v328_v9 = vsub.f32 %v321_v3, %v43_v8  ;;  %202 = vst.msk [vmem:[%s375_s2] sm:$0xff] %vm201_vm1, %v43_v8  ;;  %vm215_vm1 = vcmask 64568  }
  0xaa   :  { %77 = vrot.lane.b32.xlu0 %v328_v9, %s296_s21  ;;  %v45_v10 = vmul.f32 %v328_v9, %v328_v9 }
  0xac   :  { %v46_v11 = vsel %vm38_vm0, %v45_v10, 0.0 }
  0xad   :  { %47 = vadd.xlane.f32.xlu1 %v46_v11 }
  0xae   :  { %81 = vrot.lane.b32.xlu0 %v328_v9, %s297_s22 }
  0xcd   :  { %59 = vmax.xlane.f32.xlu0 %v58_v22 }
  0xde   :  { %v163_v12 = vpop.f32.mrf.mxu0 }
  0xdf   :  { %v168_v14 = vmul.f32 %v163_v12, %v163_v12 }
  0xe0   :  { %v165_v13 = vpop.f32.mrf.mxu0 }
  0xe1   :  { %v169_v15 = vmul.f32 %v165_v13, %v165_v13 }
  0xe3   :  { %v170_v16 = vadd.f32 %v169_v15, %v168_v14 }
  0xe5   :  { %239 = vrsqrt.f32 %v170_v16  ;;  %vm173_vm2 = vcmp.eq.f32.partialorder %v170_v16, inf  ;;  %v176_v19 = vand.u32 2147483648, %v170_v16  ;;  %vm175_vm3 = vcmp.eq.f32.partialorder %v170_v16, 0.0 }
  0xf2   :  { %v240_v17 = vpop.eup %239 }
  0xf3   :  { %v172_v18 = vmul.f32 %v240_v17, %v170_v16 }
  0xf5   :  { %v174_v20 = vsel %vm173_vm2, %v170_v16, %v172_v18  ;;  %vm221_vm2 = vcmask 72768  }
  0xf6   :  { %v177_v21 = vsel %vm175_vm3, %v176_v19, %v174_v20 }
  0xf7   :  { %178 = vadd.xlane.f32.xlu1 %v177_v21 }
 0x108   :  { %65 = vrot.lane.b32.xlu1 %v321_v3, %s296_s21 }
 0x11c   :  { %v78_v23 = vpop.permute.xlu0 %77 }
 0x11d   :  { %v80_v24 = vmul.f32 %v78_v23, %v328_v9 }
 0x11f   :  { %v85_v25 = vsel %vm72_vm4, %v80_v24, 0.0 }
 0x120   :  { %v82_v44 = vpop.permute.xlu0 %81 }
 0x121   :  { %v84_v47 = vmul.f32 %v82_v44, %v328_v9 }
 0x12c   :  { %86 = vadd.xlane.f32.xlu1 %v85_v25 }
 0x130   :  { %62 = vmin.xlane.f32.xlu1 %v61_v26 }
 0x134   :  { %199 = vmax.xlane.f32.xlu1 %v177_v21 }
 0x136   :  { %v48_v27 = vpop.xlane.xlu1 %47 }
 0x137   :  { %v50_v28 = vmul.f32 0.06666667, %v48_v27 }
 0x139   :  { %241 = vrsqrt.f32 %v50_v28  ;;  %vm53_vm6 = vcmp.eq.f32.partialorder %v50_v28, inf  ;;  %v56_v31 = vand.u32 2147483648, %v50_v28  ;;  %vm55_vm7 = vcmp.eq.f32.partialorder %v50_v28, 0.0 }
 0x13a   :  { %243 = vrcp.f32 %v48_v27 }
 0x146   :  { %v242_v29 = vpop.eup %241 }
 0x147   :  { %v52_v30 = vmul.f32 %v242_v29, %v50_v28  ;;  %v244_v50 = vpop.eup %243 }
 0x149   :  { %v54_v32 = vsel %vm53_vm6, %v50_v28, %v52_v30 }
 0x14a   :  { %v57_v33 = vsel %vm55_vm7, %v56_v31, %v54_v32 }
 0x14b   :  { %204 = vst.msk [vmem:[%s375_s2] sm:$0xff] %vm203_vm5, %v57_v33 }
 0x156   :  { %v60_v46 = vpop.xlane.xlu0 %59 }
 0x157   :  { %206 = vst.msk [vmem:[%s375_s2] sm:$0xff] %vm205_vm10, %v60_v46 }
 0x180   :  { %v179_v36 = vpop.xlane.xlu1 %178 }
 0x181   :  { %v181_v37 = vmul.f32 0.11111111, %v179_v36 }
 0x183   :  { %v185_v38 = vsub.f32 %v177_v21, %v181_v37 }
 0x184   :  { %v66_v39 = vpop.permute.xlu1 %65 }
 0x185   :  { %v68_v40 = vmul.f32 %v66_v39, %v321_v3  ;;  %v186_v41 = vsel %vm184_vm8, %v185_v38, 0.0 }
 0x186   :  { %v187_v42 = vmul.f32 %v186_v41, %v186_v41 }
 0x187   :  { %vm69_vm9 = vcmp.lt.f32.partialorder %v68_v40, 0.0 }
 0x188   :  { %188 = vadd.xlane.f32.xlu0 %v187_v42  ;;  %v229_v43 = vsel %vm69_vm9, 1.0, %v295_v0 }
 0x189   :  { %v73_v45 = vsel %vm72_vm4, %v229_v43, 0.0 }
 0x18c   :  { %74 = vadd.xlane.f32.xlu0 %v73_v45 }
 0x1b5   :  { %v87_v48 = vpop.xlane.xlu1 %86 }
 0x1b6   :  { %v88_v49 = vadd.f32 %v87_v48, %v84_v47 }
 0x1b8   :  { %v90_v51 = vmul.f32 %v244_v50, %v88_v49 }
 0x1b9   :  { %v63_v52 = vpop.xlane.xlu1 %62 }
 0x1ba   :  { %218 = vrot.lane.b32.xlu0 %v90_v51, %s298_s27  ;;  %208 = vst.msk [vmem:[%s375_s2] sm:$0xff] %vm207_vm11, %v63_v52 }
 0x1bd   :  { %v200_v61 = vpop.xlane.xlu1 %199 }
 0x211   :  { %v189_v53 = vpop.xlane.xlu0 %188 }
 0x212   :  { %v191_v54 = vmul.f32 0.125, %v189_v53 }
 0x214   :  { %245 = vrsqrt.f32 %v191_v54  ;;  %vm194_vm14 = vcmp.eq.f32.partialorder %v191_v54, inf  ;;  %v197_v58 = vand.u32 2147483648, %v191_v54  ;;  %vm196_vm0 = vcmp.eq.f32.partialorder %v191_v54, 0.0 }
 0x215   :  { %v75_v55 = vpop.xlane.xlu0 %74 }
 0x216   :  { %210 = vst.msk [vmem:[%s375_s2] sm:$0xff] %vm209_vm12, %v75_v55 }
 0x217   :  { %212 = vst.msk [vmem:[%s375_s2] sm:$0xff] %vm211_vm13, %v181_v37 }
 0x221   :  { %v246_v56 = vpop.eup %245 }
 0x222   :  { %v193_v57 = vmul.f32 %v246_v56, %v191_v54 }
 0x224   :  { %v195_v59 = vsel %vm194_vm14, %v191_v54, %v193_v57 }
 0x225   :  { %v198_v60 = vsel %vm196_vm0, %v197_v58, %v195_v59 }
 0x226   :  { %214 = vst.msk [vmem:[%s375_s2] sm:$0xff] %vm213_vm15, %v198_v60 }
 0x227   :  { %216 = vst.msk [vmem:[%s375_s2] sm:$0xff] %vm215_vm1, %v200_v61 }
 0x22c   :  { %v219_v62 = vpop.permute.xlu0 %218 }
 0x22d   :  { %222 = vst.msk [vmem:[%s375_s2] sm:$0xff] %vm221_vm2, %v219_v62 }
 0x22e   :  { %227 = vsyncpa [#allocation3], 1 }
 0x22f   :  { %228 = vsyncpa [#allocation5], 1 }

</bundles_post_ra>
